<compile_context>
chip_gen: v6e
topology: v6e:2x2x1
jax: 0.10.0
libtpu: 0.0.40
codegen_flags: <defaults>
</compile_context>

<pallas_src>
import functools
import math

import jax
import jax.numpy as jnp
from jax import lax
from jax.experimental import pallas as pl
from jax.experimental.pallas import tpu as pltpu


# ---------------------------------------------------------------------------
# Hoisted feature matmul:  (M, Fin) @ (Fin, Fout), tiled over M.
# ---------------------------------------------------------------------------
def _xw_kernel(x_ref, w_ref, o_ref):
    o_ref[...] = jnp.dot(x_ref[...], w_ref[...],
                         preferred_element_type=jnp.float32)


def feature_matmul(x2d, w, tm=256):
    M, K = x2d.shape
    Fout = w.shape[1]
    if M <= tm:
        tile_m, grid_m, Mp = M, 1, M
    else:
        tile_m = tm                                   # multiple of 8
        Mp = pl.cdiv(M, tile_m) * tile_m
        grid_m = Mp // tile_m
        if Mp != M:
            x2d = jnp.pad(x2d, ((0, Mp - M), (0, 0)))
    out = pl.pallas_call(
        _xw_kernel,
        out_shape=jax.ShapeDtypeStruct((Mp, Fout), jnp.float32),
        grid=(grid_m,),
        in_specs=[pl.BlockSpec((tile_m, K), lambda i: (i, 0)),
                  pl.BlockSpec((K, Fout), lambda i: (0, 0))],
        out_specs=pl.BlockSpec((tile_m, Fout), lambda i: (i, 0)),
        compiler_params=pltpu.CompilerParams(
            dimension_semantics=("parallel",)),
    )(x2d, w)
    return out[:M]


def _batch_block(batch, block_b):
    bt = min(block_b, batch)
    while batch % bt != 0:
        bt -= 1
    return bt


# ---------------------------------------------------------------------------
# Node layer:
#   mult = T @ diag(H_e @ p.T) @ T.T
#   adjusted_A = where(diag, adj_v, mult * adj_v)          (== (I + (1-I)*mult)*adj_v)
#   out = adjusted_A @ (H_v @ W) + bias
# ---------------------------------------------------------------------------
def _gcn_node_kernel(he_ref, adjv_ref, t_ref, hw_ref, p_ref, b_ref, o_ref):
    he = he_ref[...]                                          # (Bt, E, Fe)
    adjv = adjv_ref[...]                                      # (Bt, N, N)
    t = t_ref[...]                                            # (Bt, N, E)
    hw = hw_ref[...]                                          # (Bt, N, Fout)
    d = jnp.sum(he * p_ref[...], axis=-1)                     # (Bt, E)
    td = t * d[:, None, :]                                    # diag-scale columns
    # mult[b,i,j] = sum_e d[b,e] T[b,i,e] T[b,j,e]  -- contract E, no transpose
    mult = lax.dot_general(td, t,
                           dimension_numbers=(((2,), (2,)), ((0,), (0,))),
                           preferred_element_type=jnp.float32)  # (Bt, N, N)
    rows = lax.broadcasted_iota(jnp.int32, mult.shape, 1)
    cols = lax.broadcasted_iota(jnp.int32, mult.shape, 2)
    adj = jnp.where(rows == cols, adjv, mult * adjv)
    out = lax.dot_general(adj, hw,
                          dimension_numbers=(((2,), (1,)), ((0,), (0,))),
                          preferred_element_type=jnp.float32)   # (Bt, N, Fout)
    o_ref[...] = out + b_ref[...]


def gcn_node(hv, he, adj_v, T, w, p, bias, *, block_b=8):
    B, N, Fv = hv.shape
    E, Fe = he.shape[1], he.shape[2]
    Fout = w.shape[1]
    hw = feature_matmul(hv.reshape(B * N, Fv), w).reshape(B, N, Fout)
    bt = _batch_block(B, block_b)
    return pl.pallas_call(
        _gcn_node_kernel,
        out_shape=jax.ShapeDtypeStruct((B, N, Fout), jnp.float32),
        grid=(B // bt,),
        in_specs=[
            pl.BlockSpec((bt, E, Fe), lambda b: (b, 0, 0)),
            pl.BlockSpec((bt, N, N), lambda b: (b, 0, 0)),
            pl.BlockSpec((bt, N, E), lambda b: (b, 0, 0)),
            pl.BlockSpec((bt, N, Fout), lambda b: (b, 0, 0)),
            pl.BlockSpec((1, Fe), lambda b: (0, 0)),
            pl.BlockSpec((1, Fout), lambda b: (0, 0)),
        ],
        out_specs=pl.BlockSpec((bt, N, Fout), lambda b: (b, 0, 0)),
        compiler_params=pltpu.CompilerParams(
            dimension_semantics=("parallel",),
            vmem_limit_bytes=64 * 1024 * 1024),
    )(he, adj_v, T, hw, p, bias)


# ---------------------------------------------------------------------------
# Edge layer:
#   mult = T.T @ diag(H_v @ p.T) @ T
#   adjusted_A = where(diag, adj_e, mult * adj_e)
#   norm_A = adjusted_A / adjusted_A.max(axis=0, keepdims=True)
#   out = norm_A @ (H_e @ W) + bias
# ---------------------------------------------------------------------------
def _gcn_edge_kernel(hv_ref, adje_ref, t_ref, hw_ref, p_ref, b_ref, o_ref):
    hv = hv_ref[...]                                          # (Bt, N, Fv)
    adje = adje_ref[...]                                      # (Bt, E, E)
    t = t_ref[...]                                            # (Bt, N, E)
    hw = hw_ref[...]                                          # (Bt, E, Fout)
    d = jnp.sum(hv * p_ref[...], axis=-1)                     # (Bt, N)
    dt = t * d[:, :, None]                                    # diag-scale rows
    # mult[b,i,j] = sum_n d[b,n] T[b,n,i] T[b,n,j]  -- contract N, no transpose
    mult = lax.dot_general(dt, t,
                           dimension_numbers=(((1,), (1,)), ((0,), (0,))),
                           preferred_element_type=jnp.float32)  # (Bt, E, E)
    rows = lax.broadcasted_iota(jnp.int32, mult.shape, 1)
    cols = lax.broadcasted_iota(jnp.int32, mult.shape, 2)
    adj = jnp.where(rows == cols, adje, mult * adje)
    colmax = jnp.max(adj, axis=1, keepdims=True)              # (Bt, 1, E)
    norm = adj * pl.reciprocal(colmax)                        # E recips, not E*E divs
    out = lax.dot_general(norm, hw,
                          dimension_numbers=(((2,), (1,)), ((0,), (0,))),
                          preferred_element_type=jnp.float32)   # (Bt, E, Fout)
    o_ref[...] = out + b_ref[...]


def gcn_edge(hv, he, adj_e, T, w, p, bias, *, block_b=8):
    B, N, Fv = hv.shape
    E, Fe = he.shape[1], he.shape[2]
    Fout = w.shape[1]
    hw = feature_matmul(he.reshape(B * E, Fe), w).reshape(B, E, Fout)
    bt = _batch_block(B, block_b)
    return pl.pallas_call(
        _gcn_edge_kernel,
        out_shape=jax.ShapeDtypeStruct((B, E, Fout), jnp.float32),
        grid=(B // bt,),
        in_specs=[
            pl.BlockSpec((bt, N, Fv), lambda b: (b, 0, 0)),
            pl.BlockSpec((bt, E, E), lambda b: (b, 0, 0)),
            pl.BlockSpec((bt, N, E), lambda b: (b, 0, 0)),
            pl.BlockSpec((bt, E, Fout), lambda b: (b, 0, 0)),
            pl.BlockSpec((1, Fv), lambda b: (0, 0)),
            pl.BlockSpec((1, Fout), lambda b: (0, 0)),
        ],
        out_specs=pl.BlockSpec((bt, E, Fout), lambda b: (b, 0, 0)),
        compiler_params=pltpu.CompilerParams(
            dimension_semantics=("parallel",),
            vmem_limit_bytes=64 * 1024 * 1024),
    )(hv, adj_e, T, hw, p, bias)


# ---------------------------------------------------------------------------
# Module wrapper mirroring GraphConvolution(in_v, out_v, in_e, out_e, bias, node_layer)
# ---------------------------------------------------------------------------
class GraphConvolutionPallas:
    def __init__(self, in_features_v, out_features_v, in_features_e,
                 out_features_e, bias=True, node_layer=True, key=None):
        self.node_layer = node_layer
        k_w, k_b, k_p = jax.random.split(key, 3)
        if node_layer:
            stdv = 1.0 / math.sqrt(out_features_v)
            self.weight = jax.random.uniform(
                k_w, (in_features_v, out_features_v), jnp.float32, -stdv, stdv)
            self.p = jax.random.normal(k_p, (1, in_features_e), jnp.float32)
            self.bias = (jax.random.uniform(
                k_b, (1, out_features_v), jnp.float32, -stdv, stdv)
                if bias else jnp.zeros((1, out_features_v), jnp.float32))
        else:
            stdv = 1.0 / math.sqrt(out_features_e)
            self.weight = jax.random.uniform(
                k_w, (in_features_e, out_features_e), jnp.float32, -stdv, stdv)
            self.p = jax.random.normal(k_p, (1, in_features_v), jnp.float32)
            self.bias = (jax.random.uniform(
                k_b, (1, out_features_e), jnp.float32, -stdv, stdv)
                if bias else jnp.zeros((1, out_features_e), jnp.float32))

    def __call__(self, H_v, H_e, adj_e, adj_v, T):
        if self.node_layer:
            return gcn_node(H_v, H_e, adj_v, T, self.weight, self.p, self.bias)
        return gcn_edge(H_v, H_e, adj_e, T, self.weight, self.p, self.bias)


# ---------------------------------------------------------------------------
# Pure-JAX references (for correctness check).
# ---------------------------------------------------------------------------
def _ref_node(Hv, He, adj_v, T, w, p, b):
    d = (He @ p.T)[..., 0]                                    # (B, E)
    mult = jnp.einsum("bne,be,bme->bnm", T, d, T)
    eye = jnp.eye(T.shape[1], dtype=jnp.float32)
    adj = (eye + (1.0 - eye) * mult) * adj_v
    return jnp.einsum("bnm,bmf->bnf", adj, Hv @ w) + b


def _ref_edge(Hv, He, adj_e, T, w, p, b):
    d = (Hv @ p.T)[..., 0]                                    # (B, N)
    mult = jnp.einsum("bne,bn,bnf->bef", T, d, T)
    eye = jnp.eye(T.shape[2], dtype=jnp.float32)
    adj = (eye + (1.0 - eye) * mult) * adj_e
    norm = adj / jnp.max(adj, axis=1, keepdims=True)
    return jnp.einsum("bef,bfg->beg", norm, He @ w) + b


if __name__ == "__main__":
    key = jax.random.PRNGKey(0)
    keys = jax.random.split(key, 8)

    B, N, E = 2, 32, 64
    Fv_in, Fv_out = 16, 128          # lane-dense output feature dims
    Fe_in, Fe_out = 8, 128

    H_v = jax.random.normal(keys[0], (B, N, Fv_in), jnp.float32)
    H_e = jax.random.normal(keys[1], (B, E, Fe_in), jnp.float32)

    adj_v = jax.random.bernoulli(keys[2], 0.3, (B, N, N)).astype(jnp.float32)
    adj_v = jnp.maximum(adj_v, jnp.transpose(adj_v, (0, 2, 1)))
    adj_v = jnp.maximum(adj_v, jnp.eye(N, dtype=jnp.float32)[None])

    adj_e = jax.random.bernoulli(keys[3], 0.2, (B, E, E)).astype(jnp.float32)
    adj_e = jnp.maximum(adj_e, jnp.transpose(adj_e, (0, 2, 1)))
    adj_e = jnp.maximum(adj_e, jnp.eye(E, dtype=jnp.float32)[None])

    T = jax.random.bernoulli(keys[4], 0.15, (B, N, E)).astype(jnp.float32)

    node_layer = GraphConvolutionPallas(Fv_in, Fv_out, Fe_in, Fe_out,
                                        bias=True, node_layer=True, key=keys[5])
    edge_layer = GraphConvolutionPallas(Fv_in, Fv_out, Fe_in, Fe_out,
                                        bias=True, node_layer=False, key=keys[6])

    out_v = node_layer(H_v, H_e, adj_e, adj_v, T)
    out_e = edge_layer(H_v, H_e, adj_e, adj_v, T)
    jax.block_until_ready((out_v, out_e))

    assert out_v.shape == (B, N, Fv_out) and out_v.dtype == jnp.float32
    assert out_e.shape == (B, E, Fe_out) and out_e.dtype == jnp.float32

    ref_v = _ref_node(H_v, H_e, adj_v, T, node_layer.weight,
                      node_layer.p, node_layer.bias)
    ref_e = _ref_edge(H_v, H_e, adj_e, T, edge_layer.weight,
                      edge_layer.p, edge_layer.bias)
    assert jnp.allclose(out_v, ref_v, rtol=1e-3, atol=1e-3)
    assert jnp.allclose(out_e, ref_e, rtol=1e-3, atol=1e-3)

    print("KERNEL_OK")
</pallas_src>

<mosaic_0001>
module attributes {stable_mosaic.version = 11 : i64} {
  func.func @_xw_kernel(%arg0: i32, %arg1: memref<64x16xf32, #tpu.memory_space<vmem>>, %arg2: memref<16x128xf32, #tpu.memory_space<vmem>>, %arg3: memref<64x128xf32, #tpu.memory_space<vmem>>) attributes {dimension_semantics = [#tpu.dimension_semantics<parallel>], iteration_bounds = array<i64: 1>, scalar_prefetch = 0 : i64, scratch_operands = 0 : i64, tpu.core_type = #tpu.core_type<tc>, window_params = [{transform_indices = @transform_0, window_bounds = array<i64: 64, 16>}, {pipeline_mode = #tpu.pipeline_mode<synchronous>, transform_indices = @transform_1, window_bounds = array<i64: 16, 128>}, {transform_indices = @transform_2, window_bounds = array<i64: 64, 128>}]} {
    %c0 = arith.constant 0 : index
    %c0_0 = arith.constant 0 : index
    %0 = vector.load %arg1[%c0, %c0_0] : memref<64x16xf32, #tpu.memory_space<vmem>>, vector<64x16xf32>
    %c0_1 = arith.constant 0 : index
    %c0_2 = arith.constant 0 : index
    %1 = vector.load %arg2[%c0_1, %c0_2] : memref<16x128xf32, #tpu.memory_space<vmem>>, vector<16x128xf32>
    %cst = arith.constant dense<0.000000e+00> : vector<64x128xf32>
    %2 = tpu.matmul %0, %1, %cst {dimension_numbers = #tpu.dot_dimension_numbers<[1], [0], [0], [1], [0, 0, 1, 1], [], []>} : vector<64x16xf32>, vector<16x128xf32>, vector<64x128xf32> -> vector<64x128xf32>
    %c0_3 = arith.constant 0 : index
    %c0_4 = arith.constant 0 : index
    %3 = vector.load %arg3[%c0_3, %c0_4] : memref<64x128xf32, #tpu.memory_space<vmem>>, vector<64x128xf32>
    tpu.vector_store %arg3[%c0_3, %c0_4], %2 {strides = array<i32>} : memref<64x128xf32, #tpu.memory_space<vmem>>, vector<64x128xf32>,
    return
  }
  func.func @transform_0(%arg0: i32) -> (i32, i32) {
    %c0_i32 = arith.constant 0 : i32
    %c0_i32_0 = arith.constant 0 : i32
    return %arg0, %c0_i32 : i32, i32
  }
  func.func @transform_1(%arg0: i32) -> (i32, i32) {
    %c0_i32 = arith.constant 0 : i32
    %c0_i32_0 = arith.constant 0 : i32
    %c0_i32_1 = arith.constant 0 : i32
    return %c0_i32, %c0_i32_0 : i32, i32
  }
  func.func @transform_2(%arg0: i32) -> (i32, i32) {
    %c0_i32 = arith.constant 0 : i32
    %c0_i32_0 = arith.constant 0 : i32
    return %arg0, %c0_i32 : i32, i32
  }
}

</mosaic_0001>

<bundles_post_ra>
// kernel: tpu_custom_call.1
= control target key start
LH: loop header
LB: loop body
LE: loop exit
PB: predicated region body
PF: predicated region fallthrough
CT: control target
= control target key end

     0   :  { %vm22_vm0 = vcmask 130048   ;;  %s298_s0 = inlined_call_operand.vmem [shape: f32[64,16], index: 0, kind: input, shape index: {}]   ;;  %s299_s1 = inlined_call_operand.vmem [shape: f32[16,128], index: 1, kind: input, shape index: {}]   ;;  %s300_s2 = inlined_call_operand.hbm [shape: f32[64,128], index: 2, kind: output, shape index: {}]  }
   0x1   :  { %v21_v0 = vld [vmem:[%s299_s1 + $0x8] sm:$0xff]  ;;  %v20_v1 = vld [vmem:[%s299_s1] sm:$0xff] }
   0x2   :  { %194 = vmatprep.subr.mxu0 %v21_v0  ;;  %210 = vmatprep.subr.mxu1 %v21_v0  ;;  %v12_v2 = vld [vmem:[%s298_s0] sm:$0xff]  ;;  %v13_v4 = vld [vmem:[%s298_s0 + $0x8] sm:$0xff] }
   0x3   :  { %195 = vmatpush3.msra.mxu0 %v21_v0  ;;  %212 = vmatpush3.msra.mxu1 %v21_v0  ;;  %v16_v3 = vld [vmem:[%s298_s0 + $0x20] sm:$0xff]  ;;  %v17_v5 = vld [vmem:[%s298_s0 + $0x28] sm:$0xff] }
   0x4   :  { %196 = vmatprep.subr.mxu0 %v20_v1  ;;  %211 = vmatprep.subr.mxu1 %v20_v1 }
   0x5   :  { %7 = vsyncpa [#allocation3], 0  ;;  %197 = vmatpush3.msra.mxu0 %v20_v1  ;;  %213 = vmatpush3.msra.mxu1 %v20_v1  ;;  %v14_v6 = vld [vmem:[%s298_s0 + $0x10] sm:$0xff]  ;;  %v15_v8 = vld [vmem:[%s298_s0 + $0x18] sm:$0xff]  ;;  %s239_s28 = smov [#allocation2]  }
   0x6   :  { %v18_v7 = vld [vmem:[%s298_s0 + $0x30] sm:$0xff]  ;;  %198 = vmatprep.mubr.msk.f32.mxu0 %vm22_vm0, %v12_v2  ;;  %204 = vmatprep.mubr.msk.f32.mxu1 %vm22_vm0, %v16_v3  ;;  %v19_v9 = vld [vmem:[%s298_s0 + $0x38] sm:$0xff]  ;;  %s165_s29 = sshll.u32 %s239_s28, 4  ;;  %s166_s29 = int_to_ptr.vmem [resolvable:$true] %s165_s29 }
   0x7   :  { %199 = vmatmul.mubr.msk.f32.vlgmr.msra.gmra.mxu0 %vm22_vm0, %v13_v4  ;;  %205 = vmatmul.mubr.msk.f32.vlgmr.msra.gmra.mxu1 %vm22_vm0, %v17_v5  ;;  %s217_s0 = scalar_lea.vmem %s166_s29, 1024  ;;  %p222_p1 = scmp.lt.s32.totalorder %s166_s29, %s166_s29 }
   0x8   :  { %201 = vmatprep.mubr.msk.f32.mxu0 %vm22_vm0, %v14_v6  ;;  %207 = vmatprep.mubr.msk.f32.mxu1 %vm22_vm0, %v18_v7  ;;  %p218_p0 = scmp.ne.s32.totalorder %s166_s29, %s217_s0  ;;  %p223_p2 = scmp.lt.s32.totalorder %s217_s0, %s217_s0 }
   0xa   :  { %p224_p3 = por %p223_p2, %p222_p1 }
   0xb   :  { %202 = vmatmul.mubr.msk.f32.gmra.mxu0 %vm22_vm0, %v15_v8  ;;  %208 = vmatmul.mubr.msk.f32.gmra.mxu1 %vm22_vm0, %v19_v9 }
   0xc   :  { %p225_p4 = pnand %p224_p3, %p218_p0 }
  0xc7   :  { %v200_v10 = vpop.f32.mrf.mxu0  ;;  %v206_v11 = vpop.f32.mrf.mxu1 }
  0xc8   :  { %153 = vst [vmem:[#allocation2 + $0x8] sm:$0xff] %v200_v10  ;;  %157 = vst [vmem:[#allocation2 + $0x28] sm:$0xff] %v206_v11 }
  0xc9   :  { %v113_v12 = vpop.f32.mrf.mxu0  ;;  %v133_v13 = vpop.f32.mrf.mxu1 }
  0xca   :  { %152 = vst [vmem:[#allocation2] sm:$0xff] %v113_v12  ;;  %156 = vst [vmem:[#allocation2 + $0x20] sm:$0xff] %v133_v13 }
  0xcb   :  { %v203_v14 = vpop.f32.mrf.mxu0  ;;  %v209_v15 = vpop.f32.mrf.mxu1 }
  0xcc   :  { %155 = vst [vmem:[#allocation2 + $0x18] sm:$0xff] %v203_v14  ;;  %159 = vst [vmem:[#allocation2 + $0x38] sm:$0xff] %v209_v15 }
  0xcd   :  { %v123_v16 = vpop.f32.mrf.mxu0  ;;  %v143_v17 = vpop.f32.mrf.mxu1 }
  0xce   :  { %154 = vst [vmem:[#allocation2 + $0x10] sm:$0xff] %v123_v16  ;;  %158 = vst [vmem:[#allocation2 + $0x30] sm:$0xff] %v143_v17 }
  0xcf   :  { %228 = shalt.err (!%p225_p4)
}
  0xd0   :  { %s240_s30 = smov 128   ;;  %s241_s3 = smov 8  }
  0xd1   :  { %171 = dma.vmem_to_hbm [thread:$0]  %s166_s29, 1024, %s300_s2, [#allocation3], %s240_s30, %s240_s30, %s241_s3  }
  0xd2   :  { %237 = dma.done.wait [#allocation3], 1024  }
  0xd3   :  { %238 = vsyncadd [#allocation3], 4294966272 }
  0xd4   :  { %175 = vsyncpa [#allocation3], 1 }

</bundles_post_ra>
